<compile_context>
chip_gen: v6e
topology: v6e:2x2x1
jax: 0.10.0
libtpu: 0.0.40
codegen_flags: <defaults>
</compile_context>

<pallas_src>
import jax
import jax.numpy as jnp
from jax.experimental import pallas as pl
from jax.experimental.pallas import tpu as pltpu

_LANES = 128
_TARGET_TILE_BYTES = 4 * 1024 * 1024   # per x-tile; ~16 MiB total with double buffering


def _round_up(a: int, m: int) -> int:
    return -(-a // m) * m


def _drop_path_kernel(scale_ref, x_ref, o_ref):
    # scale_ref: (b_blk, 1[, 1]) f32 in VMEM -> broadcasts over the feature dims.
    # x_ref / o_ref: matching x.dtype tile in VMEM.
    o_ref[...] = (x_ref[...].astype(jnp.float32) * scale_ref[...]).astype(o_ref.dtype)


def drop_path(x, drop_prob: float, key, *, training: bool = True):
    """Pallas DropPath.  x: (B, ...) with leading batch dim, any float dtype."""
    if drop_prob == 0.0 or not training:
        return x
    keep_prob = 1.0 - drop_prob

    B = x.shape[0]
    F = 1
    for d in x.shape[1:]:
        F *= d

    itemsize = jnp.dtype(x.dtype).itemsize
    sub_mult = max(8, 32 // itemsize)        # sublane tiling: 8 (f32), 16 (bf16), 32 (int8/fp8)

    # Per-sample keep/drop decision, in f32 (O(B) scalars): 0.0 or 1/keep_prob.
    u = jax.random.uniform(key, (B,), dtype=jnp.float32)
    scale = jnp.floor(keep_prob + u) / jnp.float32(keep_prob)

    params = pltpu.CompilerParams(
        dimension_semantics=("parallel", "parallel"),
        vmem_limit_bytes=40 * 1024 * 1024,
    )

    if F % _LANES == 0:
        # Lane-dense path: (B, rows, 128) view is a free reshape, no padding.
        rows = F // _LANES
        b_blk = min(B, 8)                    # leading block dim: no (8,128) constraint
        rows_tile = max(
            sub_mult,
            (_TARGET_TILE_BYTES // (b_blk * _LANES * itemsize)) // sub_mult * sub_mult,
        )
        rows_tile = min(rows_tile, _round_up(rows, sub_mult))
        grid = (pl.cdiv(B, b_blk), pl.cdiv(rows, rows_tile))

        x3 = x.reshape(B, rows, _LANES)
        scale3 = scale.reshape(B, 1, 1)

        out = pl.pallas_call(
            _drop_path_kernel,
            out_shape=jax.ShapeDtypeStruct((B, rows, _LANES), x.dtype),
            grid=grid,
            in_specs=[
                pl.BlockSpec((b_blk, 1, 1), lambda b, r: (b, 0, 0)),
                pl.BlockSpec((b_blk, rows_tile, _LANES), lambda b, r: (b, r, 0)),
            ],
            out_specs=pl.BlockSpec((b_blk, rows_tile, _LANES), lambda b, r: (b, r, 0)),
            compiler_params=params,
        )(scale3, x3)
        return out.reshape(x.shape)

    # Ragged-F path: operate on the (B, F) view directly (no pad / slice copies).
    # Pallas masks the ragged last lane block; HBM traffic stays exactly 2*B*F*itemsize.
    b_blk = B if B <= sub_mult else sub_mult            # multiple of sub_mult OR == B
    padded_rows = _round_up(b_blk, sub_mult)            # VMEM sublane footprint of the block
    tile_cols = max(
        _LANES,
        (_TARGET_TILE_BYTES // (padded_rows * itemsize)) // _LANES * _LANES,
    )
    tile_cols = min(tile_cols, _round_up(F, _LANES))
    grid = (pl.cdiv(B, b_blk), pl.cdiv(F, tile_cols))

    x2 = x.reshape(B, F)
    scale2 = scale.reshape(B, 1)

    out = pl.pallas_call(
        _drop_path_kernel,
        out_shape=jax.ShapeDtypeStruct((B, F), x.dtype),
        grid=grid,
        in_specs=[
            pl.BlockSpec((b_blk, 1), lambda b, c: (b, 0)),
            pl.BlockSpec((b_blk, tile_cols), lambda b, c: (b, c)),
        ],
        out_specs=pl.BlockSpec((b_blk, tile_cols), lambda b, c: (b, c)),
        compiler_params=params,
    )(scale2, x2)
    return out.reshape(x.shape)


def _drop_path_ref(x, drop_prob, key, training=True):
    """Pure-JAX reference mirroring the PyTorch forward (same RNG draw as kernel)."""
    if drop_prob == 0.0 or not training:
        return x
    keep_prob = 1.0 - drop_prob
    u = jax.random.uniform(key, (x.shape[0],), dtype=jnp.float32)
    mask = jnp.floor(keep_prob + u)
    shape = (x.shape[0],) + (1,) * (x.ndim - 1)
    return ((x.astype(jnp.float32) / keep_prob) * mask.reshape(shape)).astype(x.dtype)


if __name__ == "__main__":
    key = jax.random.PRNGKey(0)
    k_x, k_mask = jax.random.split(key)

    # NCHW, matches the PyTorch convention.  F = 4*16*16 = 1024 -> lane-dense path.
    B, C, H, W = 2, 4, 16, 16
    drop_prob = 0.25
    x = jax.random.normal(k_x, (B, C, H, W), dtype=jnp.float32)

    out = jax.block_until_ready(drop_path(x, drop_prob, k_mask, training=True))
    ref = _drop_path_ref(x, drop_prob, k_mask, training=True)
    assert out.shape == x.shape and out.dtype == x.dtype
    assert jnp.allclose(out, ref, atol=1e-6, rtol=1e-6)

    # Non-128-multiple feature size exercises the ragged (no-pad) path.
    x_odd = jax.random.normal(k_x, (3, 3, 5, 7), dtype=jnp.float32)
    out_odd = jax.block_until_ready(drop_path(x_odd, drop_prob, k_mask, training=True))
    ref_odd = _drop_path_ref(x_odd, drop_prob, k_mask, training=True)
    assert jnp.allclose(out_odd, ref_odd, atol=1e-6, rtol=1e-6)

    # bf16 exercises the dtype-aware tiling / f32-multiply path.
    x_bf16 = x.astype(jnp.bfloat16)
    out_bf16 = jax.block_until_ready(drop_path(x_bf16, drop_prob, k_mask, training=True))
    ref_bf16 = _drop_path_ref(x_bf16, drop_prob, k_mask, training=True)
    assert out_bf16.dtype == jnp.bfloat16
    assert jnp.allclose(out_bf16.astype(jnp.float32), ref_bf16.astype(jnp.float32),
                        atol=2e-2, rtol=2e-2)

    # eval / drop_prob == 0 path is the identity, same as PyTorch.
    assert jnp.array_equal(drop_path(x, drop_prob, k_mask, training=False), x)
    assert jnp.array_equal(drop_path(x, 0.0, k_mask, training=True), x)

    print("KERNEL_OK")
</pallas_src>

<mosaic_0001>
module attributes {stable_mosaic.version = 11 : i64} {
  func.func @_drop_path_kernel(%arg0: i32, %arg1: i32, %arg2: memref<2x1x1xf32, #tpu.memory_space<vmem>>, %arg3: memref<2x8x128xf32, #tpu.memory_space<vmem>>, %arg4: memref<2x8x128xf32, #tpu.memory_space<vmem>>) attributes {dimension_semantics = [#tpu.dimension_semantics<parallel>, #tpu.dimension_semantics<parallel>], iteration_bounds = array<i64: 1, 1>, scalar_prefetch = 0 : i64, scratch_operands = 0 : i64, tpu.core_type = #tpu.core_type<tc>, window_params = [{transform_indices = @transform_0, window_bounds = array<i64: 2, 1, 1>}, {transform_indices = @transform_1, window_bounds = array<i64: 2, 8, 128>}, {transform_indices = @transform_2, window_bounds = array<i64: 2, 8, 128>}]} {
    %c0 = arith.constant 0 : index
    %c0_0 = arith.constant 0 : index
    %c0_1 = arith.constant 0 : index
    %0 = vector.load %arg3[%c0, %c0_0, %c0_1] : memref<2x8x128xf32, #tpu.memory_space<vmem>>, vector<2x8x128xf32>
    %c0_2 = arith.constant 0 : index
    %c0_3 = arith.constant 0 : index
    %c0_4 = arith.constant 0 : index
    %1 = vector.load %arg2[%c0_2, %c0_3, %c0_4] : memref<2x1x1xf32, #tpu.memory_space<vmem>>, vector<2x1x1xf32>
    %2 = vector.broadcast %1 : vector<2x1x1xf32> to vector<2x8x128xf32>
    %3 = arith.mulf %0, %2 : vector<2x8x128xf32>
    %c0_5 = arith.constant 0 : index
    %c0_6 = arith.constant 0 : index
    %c0_7 = arith.constant 0 : index
    %4 = vector.load %arg4[%c0_5, %c0_6, %c0_7] : memref<2x8x128xf32, #tpu.memory_space<vmem>>, vector<2x8x128xf32>
    tpu.vector_store %arg4[%c0_5, %c0_6, %c0_7], %3 {strides = array<i32>} : memref<2x8x128xf32, #tpu.memory_space<vmem>>, vector<2x8x128xf32>,
    return
  }
  func.func @transform_0(%arg0: i32, %arg1: i32) -> (i32, i32, i32) {
    %c0_i32 = arith.constant 0 : i32
    %c0_i32_0 = arith.constant 0 : i32
    %c0_i32_1 = arith.constant 0 : i32
    return %arg0, %c0_i32, %c0_i32_0 : i32, i32, i32
  }
  func.func @transform_1(%arg0: i32, %arg1: i32) -> (i32, i32, i32) {
    %c0_i32 = arith.constant 0 : i32
    %c0_i32_0 = arith.constant 0 : i32
    return %arg0, %arg1, %c0_i32 : i32, i32, i32
  }
  func.func @transform_2(%arg0: i32, %arg1: i32) -> (i32, i32, i32) {
    %c0_i32 = arith.constant 0 : i32
    %c0_i32_0 = arith.constant 0 : i32
    return %arg0, %arg1, %c0_i32 : i32, i32, i32
  }
}

</mosaic_0001>

<bundles_post_ra>
// kernel: tpu_custom_call.1
= control target key start
LH: loop header
LB: loop body
LE: loop exit
PB: predicated region body
PF: predicated region fallthrough
CT: control target
= control target key end

     0   :  { %7 = vsyncpa [#allocation3], 0  ;;  %s159_s0 = inlined_call_operand.vmem [shape: f32[2,1,1], index: 0, kind: input, shape index: {}]   ;;  %s160_s1 = inlined_call_operand.hbm [shape: f32[2,8,128], index: 1, kind: input, shape index: {}]   ;;  %s161_s2 = inlined_call_operand.hbm [shape: f32[2,8,128], index: 2, kind: output, shape index: {}]  }
   0x1   :  { %8 = vsyncpa [#allocation4], 0  ;;  %s121_s9 = smov [#allocation2]  }
   0x2   :  { %s16_s10 = sshll.u32 %s121_s9, 4  ;;  %s17_s10 = int_to_ptr.vmem [resolvable:$true] %s16_s10 }
   0x3   :  { %s85_s11 = scalar_lea.vmem %s17_s10, 256  ;;  %p90_p1 = scmp.lt.s32.totalorder %s17_s10, %s17_s10 }
   0x4   :  { %p86_p0 = scmp.ne.s32.totalorder %s17_s10, %s85_s11  ;;  %p91_p2 = scmp.lt.s32.totalorder %s85_s11, %s85_s11 }
   0x6   :  { %p92_p3 = por %p91_p2, %p90_p1 }
   0x8   :  { %p93_p4 = pnand %p92_p3, %p86_p0 }
   0xa   :  { %96 = shalt.err (!%p93_p4)
}
   0xb   :  { %s122_s12 = smov 128   ;;  %s123_s13 = smov 8  }
   0xc   :  { %22 = dma.hbm_to_vmem [thread:$0]  %s160_s1, 256, %s17_s10, [#allocation3], %s122_s12, %s122_s12, %s123_s13  }
   0xd   :  { %117 = dma.done.wait [#allocation3], 256  }
   0xe   :  { %118 = vsyncadd [#allocation3], 4294967040  ;;  %v124_v0 = vmov 0   ;;  %v69_v1 = vld [vmem:[%s159_s0] ss:$0 sm:$0xff]  ;;  %v27_v6 = vld [vmem:[#allocation2 + $0x8] sm:$0xff] }
   0xf   :  { %76 = vset.pattern.permute.xlu0 %v124_v0  ;;  %v70_v2 = vld [vmem:[%s159_s0 + $0x1] ss:$0 sm:$0xff]  ;;  %s125_s20 = smov [#allocation5]  }
  0x10   :  { %41 = vperm.xlu0 %76, %v69_v1   ;;  %v26_v3 = vld [vmem:[#allocation2] sm:$0xff]  ;;  %s57_s1 = sshll.u32 %s125_s20, 4  ;;  %s58_s1 = int_to_ptr.vmem [resolvable:$true] %s57_s1 }
  0x11   :  { %s97_s21 = scalar_lea.vmem %s58_s1, 256  ;;  %p102_p6 = scmp.lt.s32.totalorder %s58_s1, %s58_s1 }
  0x12   :  { %p98_p5 = scmp.ne.s32.totalorder %s58_s1, %s97_s21  ;;  %p103_p7 = scmp.lt.s32.totalorder %s97_s21, %s97_s21 }
  0x14   :  { %45 = vperm.xlu0 %76, %v70_v2   ;;  %p104_p8 = por %p103_p7, %p102_p6 }
  0x16   :  { %p105_p9 = pnand %p104_p8, %p98_p5 }
  0x8b   :  { %v42_v4 = vpop.permute.xlu0 %41 }
  0x8c   :  { %v48_v5 = vmul.f32 %v42_v4, %v26_v3 }
  0x8e   :  { %50 = vst [vmem:[#allocation5] sm:$0xff] %v48_v5 }
  0x8f   :  { %v46_v7 = vpop.permute.xlu0 %45 }
  0x90   :  { %v49_v8 = vmul.f32 %v46_v7, %v27_v6 }
  0x92   :  { %51 = vst [vmem:[#allocation5 + $0x8] sm:$0xff] %v49_v8 }
  0x93   :  { %108 = shalt.err (!%p105_p9)
}
  0x94   :  { %63 = dma.vmem_to_hbm [thread:$0]  %s58_s1, 256, %s161_s2, [#allocation4], %s122_s12, %s122_s12, %s123_s13  }
  0x95   :  { %119 = dma.done.wait [#allocation4], 256  }
  0x96   :  { %120 = vsyncadd [#allocation4], 4294967040 }
  0x97   :  { %67 = vsyncpa [#allocation3], 1 }
  0x98   :  { %68 = vsyncpa [#allocation4], 1 }

</bundles_post_ra>
